<compile_context>
chip_gen: v7x
topology: tpu7x:2x2x1
jax: 0.10.0
libtpu: 0.0.40
codegen_flags: <defaults>
</compile_context>

<pallas_src>
import functools

import jax
import jax.numpy as jnp
from jax import lax
from jax.experimental import pallas as pl
from jax.experimental.pallas import tpu as pltpu


def _round_up(x, m):
    return (x + m - 1) // m * m


def _ffn_kernel(x_ref, w1_ref, b1_ref, w2_ref, b2_ref, g_ref, beta_ref, o_ref,
                *, d_true, d_pad, eps):
    # x_ref: (TM, d_pad) tile of tokens. Keep the native dtype for the MXU.
    x = x_ref[...]

    # conv1 (1x1): MXU matmul with f32 accumulation, then bias + ReLU in f32.
    h = jnp.dot(x, w1_ref[...], preferred_element_type=jnp.float32)
    h = jnp.maximum(h + b1_ref[...].astype(jnp.float32), 0.0)

    # conv2 (1x1): feed the MXU in the weight dtype (bf16 stays bf16); f32 acc.
    y = jnp.dot(h.astype(w2_ref.dtype), w2_ref[...],
                preferred_element_type=jnp.float32)
    # bias + residual (single f32 VPU add chain).
    y = y + (b2_ref[...].astype(jnp.float32) + x.astype(jnp.float32))

    # LayerNorm over the true d_embed. Padded lanes of y are exactly zero
    # (zero-padded weights / bias / residual), so the sum is already correct;
    # only the variance needs the lane mask.
    inv_d = jnp.float32(1.0 / d_true)
    mean = jnp.sum(y, axis=-1, keepdims=True) * inv_d
    centered = y - mean
    if d_pad != d_true:
        lane = lax.broadcasted_iota(jnp.int32, (1, d_pad), 1)
        centered = jnp.where(lane < d_true, centered, 0.0)
    var = jnp.sum(centered * centered, axis=-1, keepdims=True) * inv_d
    normed = centered * lax.rsqrt(var + jnp.float32(eps))
    o_ref[...] = (normed * g_ref[...].astype(jnp.float32)
                  + beta_ref[...].astype(jnp.float32)).astype(o_ref.dtype)


def _choose_token_tile(n_tokens, d_pad, h_pad, itemsize,
                       budget_bytes=24 * 1024 * 1024):
    """Pick the largest token tile that keeps the kernel inside a VMEM budget
    that is safe on v5e/v6e (128 MiB) and v7x (64 MiB)."""
    # Grid-invariant operands (W1^T, W2^T, biases, gamma, beta); assume the
    # worst case of double buffering even though we request Buffered(1).
    resident = 2 * itemsize * (2 * d_pad * h_pad + 2 * h_pad + 3 * d_pad)
    # Per-token VMEM: x + out tiles (double buffered, native dtype) plus the
    # f32 h / y intermediates.
    per_token = 2 * 2 * d_pad * itemsize + 4 * (h_pad + d_pad)
    avail = max(budget_bytes - resident, 8 * 1024 * 1024)
    cap = max(8, int(avail // per_token) // 8 * 8)
    n_pad = _round_up(n_tokens, 8)
    tile = int(min(1024, cap, n_pad))
    # Keep at least 2 grid steps so v7x's 2 TensorCores both get work,
    # but never shrink tiles below 256 tokens to do so.
    if tile == n_pad and n_pad >= 512:
        tile = (n_pad // 2) // 8 * 8
    return tile


def poswise_ffn(x, w1, b1, w2, b2, gamma, beta, *, token_tile=None):
    """x: (B, S, d_embed). w1: (d_hidden, d_embed), w2: (d_embed, d_hidden)
    (PyTorch Conv1d weight convention with the kernel dim squeezed).
    Pass bf16 x / weights for best MXU throughput; accumulation is f32."""
    B, S, D = x.shape
    H = w1.shape[0]
    N = B * S
    dtype = x.dtype
    itemsize = jnp.dtype(dtype).itemsize

    # Lane-dense padding of the feature dims (multiples of 128).
    Dp = _round_up(D, 128)
    Hp = _round_up(H, 128)

    if token_tile is None:
        token_tile = _choose_token_tile(N, Dp, Hp, itemsize)
    assert token_tile % 8 == 0, "token_tile must be a multiple of 8"
    Np = _round_up(N, token_tile)
    grid = (Np // token_tile,)

    # Zero-pad: padded weight rows/cols contribute exactly 0, padded tokens are
    # sliced off at the end, so semantics are unchanged.
    x2d = jnp.pad(x.reshape(N, D), ((0, Np - N), (0, Dp - D)))
    w1_t = jnp.pad(jnp.transpose(w1).astype(dtype), ((0, Dp - D), (0, Hp - H)))
    w2_t = jnp.pad(jnp.transpose(w2).astype(dtype), ((0, Hp - H), (0, Dp - D)))
    b1p = jnp.pad(b1, (0, Hp - H)).reshape(1, Hp)
    b2p = jnp.pad(b2, (0, Dp - D)).reshape(1, Dp)
    gp = jnp.pad(gamma, (0, Dp - D)).reshape(1, Dp)
    bp = jnp.pad(beta, (0, Dp - D)).reshape(1, Dp)

    kernel = functools.partial(_ffn_kernel, d_true=D, d_pad=Dp, eps=1e-5)

    # TODO(synk): add hidden-dim (H) tiling with an f32 accumulator for the
    # second matmul when d_embed*d_hidden weights alone exceed the VMEM budget
    # (relevant on v7x's 64 MiB VMEM at very large model dims).

    def build(const_pipeline_mode):
        def const_spec(shape):
            if const_pipeline_mode is None:
                return pl.BlockSpec(shape, lambda i: (0, 0))
            return pl.BlockSpec(shape, lambda i: (0, 0),
                                pipeline_mode=const_pipeline_mode)

        return pl.pallas_call(
            kernel,
            out_shape=jax.ShapeDtypeStruct((Np, Dp), dtype),
            grid_spec=pltpu.PrefetchScalarGridSpec(
                num_scalar_prefetch=0,
                grid=grid,
                in_specs=[
                    pl.BlockSpec((token_tile, Dp), lambda i: (i, 0)),  # x tile
                    const_spec((Dp, Hp)),    # W1^T   (grid-invariant)
                    const_spec((1, Hp)),     # b1
                    const_spec((Hp, Dp)),    # W2^T
                    const_spec((1, Dp)),     # b2
                    const_spec((1, Dp)),     # gamma
                    const_spec((1, Dp)),     # beta
                ],
                out_specs=pl.BlockSpec((token_tile, Dp), lambda i: (i, 0)),
            ),
            compiler_params=pltpu.CompilerParams(
                dimension_semantics=("parallel",),
                vmem_limit_bytes=48 * 1024 * 1024,
            ),
        )

    args = (x2d, w1_t, b1p, w2_t, b2p, gp, bp)
    try:
        # Single-buffer the grid-invariant operands (halves their VMEM cost).
        out = build(pl.Buffered(1))(*args)
    except Exception:
        # Fallback for lowerings that reject a buffer count of 1.
        out = build(None)(*args)

    return out[:N, :D].reshape(B, S, D)


def _reference(x, w1, b1, w2, b2, gamma, beta):
    # Pure-JAX reference mirroring the PyTorch forward.
    h = jnp.maximum(jnp.einsum("bsd,hd->bsh", x, w1) + b1, 0.0)
    y = jnp.einsum("bsh,dh->bsd", h, w2) + b2 + x
    mean = jnp.mean(y, axis=-1, keepdims=True)
    var = jnp.mean((y - mean) ** 2, axis=-1, keepdims=True)
    return (y - mean) / jnp.sqrt(var + 1e-5) * gamma + beta


if __name__ == "__main__":
    # Small shapes consistent with the module's forward.
    B, S, d_embed, d_hidden = 2, 8, 32, 64

    key = jax.random.PRNGKey(0)
    kx, k1, kb1, k2, kb2 = jax.random.split(key, 5)

    x = jax.random.normal(kx, (B, S, d_embed), dtype=jnp.float32)

    # Deterministic parameters (Conv1d weight shape (out, in, 1) -> squeeze k).
    w1 = jax.random.normal(k1, (d_hidden, d_embed), dtype=jnp.float32) * 0.1
    b1 = jax.random.normal(kb1, (d_hidden,), dtype=jnp.float32) * 0.01
    w2 = jax.random.normal(k2, (d_embed, d_hidden), dtype=jnp.float32) * 0.1
    b2 = jax.random.normal(kb2, (d_embed,), dtype=jnp.float32) * 0.01
    gamma = jnp.ones((d_embed,), dtype=jnp.float32)   # LayerNorm weight init
    beta = jnp.zeros((d_embed,), dtype=jnp.float32)   # LayerNorm bias init

    out = poswise_ffn(x, w1, b1, w2, b2, gamma, beta)
    out = jax.block_until_ready(out)

    ref = _reference(x, w1, b1, w2, b2, gamma, beta)
    assert out.shape == (B, S, d_embed)
    assert jnp.allclose(out, ref, atol=1e-4, rtol=1e-4), "mismatch vs reference"

    print("KERNEL_OK")
</pallas_src>

<mosaic_0001>
module attributes {stable_mosaic.version = 11 : i64} {
  func.func @_ffn_kernel(%arg0: i32, %arg1: memref<16x128xf32, #tpu.memory_space<vmem>>, %arg2: memref<128x128xf32, #tpu.memory_space<vmem>>, %arg3: memref<1x128xf32, #tpu.memory_space<vmem>>, %arg4: memref<128x128xf32, #tpu.memory_space<vmem>>, %arg5: memref<1x128xf32, #tpu.memory_space<vmem>>, %arg6: memref<1x128xf32, #tpu.memory_space<vmem>>, %arg7: memref<1x128xf32, #tpu.memory_space<vmem>>, %arg8: memref<16x128xf32, #tpu.memory_space<vmem>>) attributes {dimension_semantics = [#tpu.dimension_semantics<parallel>], iteration_bounds = array<i64: 1>, scalar_prefetch = 0 : i64, scratch_operands = 0 : i64, tpu.core_type = #tpu.core_type<tc>, window_params = [{transform_indices = @transform_0, window_bounds = array<i64: 16, 128>}, {pipeline_mode = #tpu.pipeline_mode<synchronous>, transform_indices = @transform_1, window_bounds = array<i64: 128, 128>}, {pipeline_mode = #tpu.pipeline_mode<synchronous>, transform_indices = @transform_2, window_bounds = array<i64: 1, 128>}, {pipeline_mode = #tpu.pipeline_mode<synchronous>, transform_indices = @transform_3, window_bounds = array<i64: 128, 128>}, {pipeline_mode = #tpu.pipeline_mode<synchronous>, transform_indices = @transform_4, window_bounds = array<i64: 1, 128>}, {pipeline_mode = #tpu.pipeline_mode<synchronous>, transform_indices = @transform_5, window_bounds = array<i64: 1, 128>}, {pipeline_mode = #tpu.pipeline_mode<synchronous>, transform_indices = @transform_6, window_bounds = array<i64: 1, 128>}, {transform_indices = @transform_7, window_bounds = array<i64: 16, 128>}]} {
    %c0 = arith.constant 0 : index
    %c0_0 = arith.constant 0 : index
    %0 = vector.load %arg1[%c0, %c0_0] : memref<16x128xf32, #tpu.memory_space<vmem>>, vector<16x128xf32>
    %c0_1 = arith.constant 0 : index
    %c0_2 = arith.constant 0 : index
    %1 = vector.load %arg2[%c0_1, %c0_2] : memref<128x128xf32, #tpu.memory_space<vmem>>, vector<128x128xf32>
    %cst = arith.constant dense<0.000000e+00> : vector<16x128xf32>
    %2 = tpu.matmul %0, %1, %cst {dimension_numbers = #tpu.dot_dimension_numbers<[1], [0], [0], [1], [0, 0, 1, 1], [], []>} : vector<16x128xf32>, vector<128x128xf32>, vector<16x128xf32> -> vector<16x128xf32>
    %c0_3 = arith.constant 0 : index
    %c0_4 = arith.constant 0 : index
    %3 = vector.load %arg3[%c0_3, %c0_4] : memref<1x128xf32, #tpu.memory_space<vmem>>, vector<1x128xf32>
    %4 = vector.broadcast %3 : vector<1x128xf32> to vector<16x128xf32>
    %5 = arith.addf %2, %4 : vector<16x128xf32>
    %cst_5 = arith.constant 0.000000e+00 : f32
    %6 = vector.broadcast %cst_5 : f32 to vector<16x128xf32>
    %7 = arith.maximumf %5, %6 : vector<16x128xf32>
    %c0_6 = arith.constant 0 : index
    %c0_7 = arith.constant 0 : index
    %8 = vector.load %arg4[%c0_6, %c0_7] : memref<128x128xf32, #tpu.memory_space<vmem>>, vector<128x128xf32>
    %cst_8 = arith.constant dense<0.000000e+00> : vector<16x128xf32>
    %9 = tpu.matmul %7, %8, %cst_8 {dimension_numbers = #tpu.dot_dimension_numbers<[1], [0], [0], [1], [0, 0, 1, 1], [], []>} : vector<16x128xf32>, vector<128x128xf32>, vector<16x128xf32> -> vector<16x128xf32>
    %c0_9 = arith.constant 0 : index
    %c0_10 = arith.constant 0 : index
    %10 = vector.load %arg5[%c0_9, %c0_10] : memref<1x128xf32, #tpu.memory_space<vmem>>, vector<1x128xf32>
    %11 = vector.broadcast %10 : vector<1x128xf32> to vector<16x128xf32>
    %12 = arith.addf %11, %0 : vector<16x128xf32>
    %13 = arith.addf %9, %12 : vector<16x128xf32>
    %cst_11 = arith.constant dense<0.000000e+00> : vector<16xf32>
    %14 = vector.multi_reduction <add>, %13, %cst_11 [1] : vector<16x128xf32> to vector<16xf32>
    %15 = vector.shape_cast %14 : vector<16xf32> to vector<16x1xf32>
    %cst_12 = arith.constant 3.125000e-02 : f32
    %16 = vector.broadcast %cst_12 : f32 to vector<16x1xf32>
    %17 = arith.mulf %15, %16 : vector<16x1xf32>
    %18 = vector.broadcast %17 : vector<16x1xf32> to vector<16x128xf32>
    %19 = arith.subf %13, %18 : vector<16x128xf32>
    %20 = tpu.iota {dimensions = array<i32: 1>} : vector<1x128xi32>
    %c32_i32 = arith.constant 32 : i32
    %21 = vector.broadcast %c32_i32 : i32 to vector<1x128xi32>
    %22 = arith.cmpi slt, %20, %21 : vector<1x128xi32>
    %cst_13 = arith.constant 0.000000e+00 : f32
    %23 = vector.shape_cast %22 : vector<1x128xi1> to vector<1x128xi1>
    %24 = vector.broadcast %23 : vector<1x128xi1> to vector<16x128xi1>
    %25 = vector.broadcast %cst_13 : f32 to vector<16x128xf32>
    %26 = arith.select %24, %19, %25 : vector<16x128xi1>, vector<16x128xf32>
    %27 = arith.mulf %26, %26 : vector<16x128xf32>
    %cst_14 = arith.constant dense<0.000000e+00> : vector<16xf32>
    %28 = vector.multi_reduction <add>, %27, %cst_14 [1] : vector<16x128xf32> to vector<16xf32>
    %29 = vector.shape_cast %28 : vector<16xf32> to vector<16x1xf32>
    %cst_15 = arith.constant 3.125000e-02 : f32
    %30 = vector.broadcast %cst_15 : f32 to vector<16x1xf32>
    %31 = arith.mulf %29, %30 : vector<16x1xf32>
    %cst_16 = arith.constant 9.99999974E-6 : f32
    %32 = vector.broadcast %cst_16 : f32 to vector<16x1xf32>
    %33 = arith.addf %31, %32 : vector<16x1xf32>
    %34 = math.rsqrt %33 : vector<16x1xf32>
    %35 = vector.broadcast %34 : vector<16x1xf32> to vector<16x128xf32>
    %36 = arith.mulf %26, %35 : vector<16x128xf32>
    %c0_17 = arith.constant 0 : index
    %c0_18 = arith.constant 0 : index
    %37 = vector.load %arg6[%c0_17, %c0_18] : memref<1x128xf32, #tpu.memory_space<vmem>>, vector<1x128xf32>
    %38 = vector.broadcast %37 : vector<1x128xf32> to vector<16x128xf32>
    %39 = arith.mulf %36, %38 : vector<16x128xf32>
    %c0_19 = arith.constant 0 : index
    %c0_20 = arith.constant 0 : index
    %40 = vector.load %arg7[%c0_19, %c0_20] : memref<1x128xf32, #tpu.memory_space<vmem>>, vector<1x128xf32>
    %41 = vector.broadcast %40 : vector<1x128xf32> to vector<16x128xf32>
    %42 = arith.addf %39, %41 : vector<16x128xf32>
    %c0_21 = arith.constant 0 : index
    %c0_22 = arith.constant 0 : index
    %43 = vector.load %arg8[%c0_21, %c0_22] : memref<16x128xf32, #tpu.memory_space<vmem>>, vector<16x128xf32>
    tpu.vector_store %arg8[%c0_21, %c0_22], %42 {strides = array<i32>} : memref<16x128xf32, #tpu.memory_space<vmem>>, vector<16x128xf32>,
    return
  }
  func.func @transform_0(%arg0: i32) -> (i32, i32) {
    %c0_i32 = arith.constant 0 : i32
    %c0_i32_0 = arith.constant 0 : i32
    return %arg0, %c0_i32 : i32, i32
  }
  func.func @transform_1(%arg0: i32) -> (i32, i32) {
    %c0_i32 = arith.constant 0 : i32
    %c0_i32_0 = arith.constant 0 : i32
    %c0_i32_1 = arith.constant 0 : i32
    return %c0_i32, %c0_i32_0 : i32, i32
  }
  func.func @transform_2(%arg0: i32) -> (i32, i32) {
    %c0_i32 = arith.constant 0 : i32
    %c0_i32_0 = arith.constant 0 : i32
    %c0_i32_1 = arith.constant 0 : i32
    return %c0_i32, %c0_i32_0 : i32, i32
  }
  func.func @transform_3(%arg0: i32) -> (i32, i32) {
    %c0_i32 = arith.constant 0 : i32
    %c0_i32_0 = arith.constant 0 : i32
    %c0_i32_1 = arith.constant 0 : i32
    return %c0_i32, %c0_i32_0 : i32, i32
  }
  func.func @transform_4(%arg0: i32) -> (i32, i32) {
    %c0_i32 = arith.constant 0 : i32
    %c0_i32_0 = arith.constant 0 : i32
    %c0_i32_1 = arith.constant 0 : i32
    return %c0_i32, %c0_i32_0 : i32, i32
  }
  func.func @transform_5(%arg0: i32) -> (i32, i32) {
    %c0_i32 = arith.constant 0 : i32
    %c0_i32_0 = arith.constant 0 : i32
    %c0_i32_1 = arith.constant 0 : i32
    return %c0_i32, %c0_i32_0 : i32, i32
  }
  func.func @transform_6(%arg0: i32) -> (i32, i32) {
    %c0_i32 = arith.constant 0 : i32
    %c0_i32_0 = arith.constant 0 : i32
    %c0_i32_1 = arith.constant 0 : i32
    return %c0_i32, %c0_i32_0 : i32, i32
  }
  func.func @transform_7(%arg0: i32) -> (i32, i32) {
    %c0_i32 = arith.constant 0 : i32
    %c0_i32_0 = arith.constant 0 : i32
    return %arg0, %c0_i32 : i32, i32
  }
}

module attributes {stable_mosaic.version = 11 : i64} {
  func.func @_ffn_kernel(%arg0: i32, %arg1: memref<16x128xf32, #tpu.memory_space<vmem>>, %arg2: memref<128x128xf32, #tpu.memory_space<vmem>>, %arg3: memref<1x128xf32, #tpu.memory_space<vmem>>, %arg4: memref<128x128xf32, #tpu.memory_space<vmem>>, %arg5: memref<1x128xf32, #tpu.memory_space<vmem>>, %arg6: memref<1x128xf32, #tpu.memory_space<vmem>>, %arg7: memref<1x128xf32, #tpu.memory_space<vmem>>, %arg8: memref<16x128xf32, #tpu.memory_space<vmem>>) attributes {dimension_semantics = [#tpu.dimension_semantics<parallel>], iteration_bounds = array<i64: 1>, scalar_prefetch = 0 : i64, scratch_operands = 0 : i64, tpu.core_type = #tpu.core_type<tc>, window_params = [{transform_indices = @transform_0, window_bounds = array<i64: 16, 128>}, {pipeline_mode = #tpu.pipeline_mode<synchronous>, transform_indices = @transform_1, window_bounds = array<i64: 128, 128>}, {pipeline_mode = #tpu.pipeline_mode<synchronous>, transform_indices = @transform_2, window_bounds = array<i64: 1, 128>}, {pipeline_mode = #tpu.pipeline_mode<synchronous>, transform_indices = @transform_3, window_bounds = array<i64: 128, 128>}, {pipeline_mode = #tpu.pipeline_mode<synchronous>, transform_indices = @transform_4, window_bounds = array<i64: 1, 128>}, {pipeline_mode = #tpu.pipeline_mode<synchronous>, transform_indices = @transform_5, window_bounds = array<i64: 1, 128>}, {pipeline_mode = #tpu.pipeline_mode<synchronous>, transform_indices = @transform_6, window_bounds = array<i64: 1, 128>}, {transform_indices = @transform_7, window_bounds = array<i64: 16, 128>}]} {
    %c0 = arith.constant 0 : index
    %c0_0 = arith.constant 0 : index
    %0 = vector.load %arg1[%c0, %c0_0] : memref<16x128xf32, #tpu.memory_space<vmem>>, vector<16x128xf32>
    %c0_1 = arith.constant 0 : index
    %c0_2 = arith.constant 0 : index
    %1 = vector.load %arg2[%c0_1, %c0_2] : memref<128x128xf32, #tpu.memory_space<vmem>>, vector<128x128xf32>
    %cst = arith.constant dense<0.000000e+00> : vector<16x128xf32>
    %2 = tpu.matmul %0, %1, %cst {dimension_numbers = #tpu.dot_dimension_numbers<[1], [0], [0], [1], [0, 0, 1, 1], [], []>} : vector<16x128xf32>, vector<128x128xf32>, vector<16x128xf32> -> vector<16x128xf32>
    %c0_3 = arith.constant 0 : index
    %c0_4 = arith.constant 0 : index
    %3 = vector.load %arg3[%c0_3, %c0_4] : memref<1x128xf32, #tpu.memory_space<vmem>>, vector<1x128xf32>
    %4 = vector.broadcast %3 : vector<1x128xf32> to vector<16x128xf32>
    %5 = arith.addf %2, %4 : vector<16x128xf32>
    %cst_5 = arith.constant 0.000000e+00 : f32
    %6 = vector.broadcast %cst_5 : f32 to vector<16x128xf32>
    %7 = arith.maximumf %5, %6 : vector<16x128xf32>
    %c0_6 = arith.constant 0 : index
    %c0_7 = arith.constant 0 : index
    %8 = vector.load %arg4[%c0_6, %c0_7] : memref<128x128xf32, #tpu.memory_space<vmem>>, vector<128x128xf32>
    %cst_8 = arith.constant dense<0.000000e+00> : vector<16x128xf32>
    %9 = tpu.matmul %7, %8, %cst_8 {dimension_numbers = #tpu.dot_dimension_numbers<[1], [0], [0], [1], [0, 0, 1, 1], [], []>} : vector<16x128xf32>, vector<128x128xf32>, vector<16x128xf32> -> vector<16x128xf32>
    %c0_9 = arith.constant 0 : index
    %c0_10 = arith.constant 0 : index
    %10 = vector.load %arg5[%c0_9, %c0_10] : memref<1x128xf32, #tpu.memory_space<vmem>>, vector<1x128xf32>
    %11 = vector.broadcast %10 : vector<1x128xf32> to vector<16x128xf32>
    %12 = arith.addf %11, %0 : vector<16x128xf32>
    %13 = arith.addf %9, %12 : vector<16x128xf32>
    %cst_11 = arith.constant dense<0.000000e+00> : vector<16xf32>
    %14 = vector.multi_reduction <add>, %13, %cst_11 [1] : vector<16x128xf32> to vector<16xf32>
    %15 = vector.shape_cast %14 : vector<16xf32> to vector<16x1xf32>
    %cst_12 = arith.constant 3.125000e-02 : f32
    %16 = vector.broadcast %cst_12 : f32 to vector<16x1xf32>
    %17 = arith.mulf %15, %16 : vector<16x1xf32>
    %18 = vector.broadcast %17 : vector<16x1xf32> to vector<16x128xf32>
    %19 = arith.subf %13, %18 : vector<16x128xf32>
    %20 = tpu.iota {dimensions = array<i32: 1>} : vector<1x128xi32>
    %c32_i32 = arith.constant 32 : i32
    %21 = vector.broadcast %c32_i32 : i32 to vector<1x128xi32>
    %22 = arith.cmpi slt, %20, %21 : vector<1x128xi32>
    %cst_13 = arith.constant 0.000000e+00 : f32
    %23 = vector.shape_cast %22 : vector<1x128xi1> to vector<1x128xi1>
    %24 = vector.broadcast %23 : vector<1x128xi1> to vector<16x128xi1>
    %25 = vector.broadcast %cst_13 : f32 to vector<16x128xf32>
    %26 = arith.select %24, %19, %25 : vector<16x128xi1>, vector<16x128xf32>
    %27 = arith.mulf %26, %26 : vector<16x128xf32>
    %cst_14 = arith.constant dense<0.000000e+00> : vector<16xf32>
    %28 = vector.multi_reduction <add>, %27, %cst_14 [1] : vector<16x128xf32> to vector<16xf32>
    %29 = vector.shape_cast %28 : vector<16xf32> to vector<16x1xf32>
    %cst_15 = arith.constant 3.125000e-02 : f32
    %30 = vector.broadcast %cst_15 : f32 to vector<16x1xf32>
    %31 = arith.mulf %29, %30 : vector<16x1xf32>
    %cst_16 = arith.constant 9.99999974E-6 : f32
    %32 = vector.broadcast %cst_16 : f32 to vector<16x1xf32>
    %33 = arith.addf %31, %32 : vector<16x1xf32>
    %34 = math.rsqrt %33 : vector<16x1xf32>
    %35 = vector.broadcast %34 : vector<16x1xf32> to vector<16x128xf32>
    %36 = arith.mulf %26, %35 : vector<16x128xf32>
    %c0_17 = arith.constant 0 : index
    %c0_18 = arith.constant 0 : index
    %37 = vector.load %arg6[%c0_17, %c0_18] : memref<1x128xf32, #tpu.memory_space<vmem>>, vector<1x128xf32>
    %38 = vector.broadcast %37 : vector<1x128xf32> to vector<16x128xf32>
    %39 = arith.mulf %36, %38 : vector<16x128xf32>
    %c0_19 = arith.constant 0 : index
    %c0_20 = arith.constant 0 : index
    %40 = vector.load %arg7[%c0_19, %c0_20] : memref<1x128xf32, #tpu.memory_space<vmem>>, vector<1x128xf32>
    %41 = vector.broadcast %40 : vector<1x128xf32> to vector<16x128xf32>
    %42 = arith.addf %39, %41 : vector<16x128xf32>
    %c0_21 = arith.constant 0 : index
    %c0_22 = arith.constant 0 : index
    %43 = vector.load %arg8[%c0_21, %c0_22] : memref<16x128xf32, #tpu.memory_space<vmem>>, vector<16x128xf32>
    tpu.vector_store %arg8[%c0_21, %c0_22], %42 {strides = array<i32>} : memref<16x128xf32, #tpu.memory_space<vmem>>, vector<16x128xf32>,
    return
  }
  func.func @transform_0(%arg0: i32) -> (i32, i32) {
    %c0_i32 = arith.constant 0 : i32
    %c0_i32_0 = arith.constant 0 : i32
    return %arg0, %c0_i32 : i32, i32
  }
  func.func @transform_1(%arg0: i32) -> (i32, i32) {
    %c0_i32 = arith.constant 0 : i32
    %c0_i32_0 = arith.constant 0 : i32
    %c0_i32_1 = arith.constant 0 : i32
    return %c0_i32, %c0_i32_0 : i32, i32
  }
  func.func @transform_2(%arg0: i32) -> (i32, i32) {
    %c0_i32 = arith.constant 0 : i32
    %c0_i32_0 = arith.constant 0 : i32
    %c0_i32_1 = arith.constant 0 : i32
    return %c0_i32, %c0_i32_0 : i32, i32
  }
  func.func @transform_3(%arg0: i32) -> (i32, i32) {
    %c0_i32 = arith.constant 0 : i32
    %c0_i32_0 = arith.constant 0 : i32
    %c0_i32_1 = arith.constant 0 : i32
    return %c0_i32, %c0_i32_0 : i32, i32
  }
  func.func @transform_4(%arg0: i32) -> (i32, i32) {
    %c0_i32 = arith.constant 0 : i32
    %c0_i32_0 = arith.constant 0 : i32
    %c0_i32_1 = arith.constant 0 : i32
    return %c0_i32, %c0_i32_0 : i32, i32
  }
  func.func @transform_5(%arg0: i32) -> (i32, i32) {
    %c0_i32 = arith.constant 0 : i32
    %c0_i32_0 = arith.constant 0 : i32
    %c0_i32_1 = arith.constant 0 : i32
    return %c0_i32, %c0_i32_0 : i32, i32
  }
  func.func @transform_6(%arg0: i32) -> (i32, i32) {
    %c0_i32 = arith.constant 0 : i32
    %c0_i32_0 = arith.constant 0 : i32
    %c0_i32_1 = arith.constant 0 : i32
    return %c0_i32, %c0_i32_0 : i32, i32
  }
  func.func @transform_7(%arg0: i32) -> (i32, i32) {
    %c0_i32 = arith.constant 0 : i32
    %c0_i32_0 = arith.constant 0 : i32
    return %arg0, %c0_i32 : i32, i32
  }
}

</mosaic_0001>

<bundles_post_ra>
// kernel: tpu_custom_call.1
= control target key start
LH: loop header
LB: loop body
LE: loop exit
PB: predicated region body
PF: predicated region fallthrough
CT: control target
= control target key end

     0   :  { %12 = vsyncpa [#allocation3], 0  ;;  %s744_s0 = inlined_call_operand.hbm [shape: f32[16,128], index: 0, kind: input, shape index: {}]   ;;  %s745_s1 = inlined_call_operand.hbm [shape: f32[128,128], index: 1, kind: input, shape index: {}]   ;;  %s746_s2 = inlined_call_operand.vmem [shape: f32[1,128], index: 2, kind: input, shape index: {}]   ;;  %s747_s3 = inlined_call_operand.hbm [shape: f32[128,128], index: 3, kind: input, shape index: {}]   ;;  %s748_s4 = inlined_call_operand.vmem [shape: f32[1,128], index: 4, kind: input, shape index: {}]   ;;  %s749_s5 = inlined_call_operand.vmem [shape: f32[1,128], index: 5, kind: input, shape index: {}]   ;;  %s750_s6 = inlined_call_operand.vmem [shape: f32[1,128], index: 6, kind: input, shape index: {}]   ;;  %s751_s7 = inlined_call_operand.hbm [shape: f32[16,128], index: 7, kind: output, shape index: {}]  }
   0x1   :  { %13 = vsyncpa [#allocation6], 0 }
   0x2   :  { %14 = vsyncpa [#allocation4], 0  ;;  %s615_s24 = smov [#allocation5]   ;;  %s616_s26 = smov [#allocation2]  }
   0x3   :  { %s32_s25 = sshll.u32 %s615_s24, 4  ;;  %s20_s27 = sshll.u32 %s616_s26, 4  ;;  %s33_s25 = int_to_ptr.vmem [resolvable:$true] %s32_s25  ;;  %s661_s27 = int_to_ptr.vmem [resolvable:$true] %s20_s27 }
   0x4   :  { %s521_s30 = scalar_lea.hbm %s745_s1, 2048 }
   0x5   :  { %p522_p0 = scmp.ne.s32.totalorder %s745_s1, %s521_s30  ;;  %p525_p1 = scmp.lt.u32.totalorder %s521_s30, %s745_s1 }
   0x7   :  { %p527_p2 = pnand %p525_p1, %p522_p0 }
   0x9   :  { %530 = shalt.err (!%p527_p2)
}
   0xa   :  { %s531_s12 = scalar_lea.vmem %s33_s25, 2048  ;;  %p536_p4 = scmp.lt.s32.totalorder %s33_s25, %s33_s25 }
   0xb   :  { %p532_p3 = scmp.ne.s32.totalorder %s33_s25, %s531_s12  ;;  %p537_p5 = scmp.lt.s32.totalorder %s531_s12, %s531_s12 }
   0xd   :  { %p538_p6 = por %p537_p5, %p536_p4 }
   0xf   :  { %p539_p7 = pnand %p538_p6, %p532_p3 }
  0x11   :  { %542 = shalt.err (!%p539_p7)
}
  0x12   :  { %s617_s13 = smov 128   ;;  %s618_s14 = smov 8  }
  0x13   :  { %38 = dma.hbm_to_vmem [thread:$0]  %s745_s1, 2048, %s33_s25, [#allocation6], %s617_s13, %s617_s13, %s618_s14  }
  0x14   :  { %s543_s19 = scalar_lea.hbm %s744_s0, 256 }
  0x15   :  { %p544_p8 = scmp.ne.s32.totalorder %s744_s0, %s543_s19  ;;  %p547_p9 = scmp.lt.u32.totalorder %s543_s19, %s744_s0 }
  0x17   :  { %p549_p10 = pnand %p547_p9, %p544_p8 }
  0x19   :  { %552 = shalt.err (!%p549_p10)
}
  0x1a   :  { %s553_s24 = scalar_lea.vmem %s661_s27, 256  ;;  %p558_p12 = scmp.lt.s32.totalorder %s661_s27, %s661_s27 }
  0x1b   :  { %p554_p11 = scmp.ne.s32.totalorder %s661_s27, %s553_s24  ;;  %p559_p13 = scmp.lt.s32.totalorder %s553_s24, %s553_s24 }
  0x1d   :  { %p560_p0 = por %p559_p13, %p558_p12 }
  0x1f   :  { %p561_p1 = pnand %p560_p0, %p554_p11 }
  0x21   :  { %564 = shalt.err (!%p561_p1)
}
  0x22   :  { %26 = dma.hbm_to_vmem [thread:$0]  %s744_s0, 256, %s661_s27, [#allocation3], %s617_s13, %s617_s13, %s618_s14  }
  0x23   :  { %s619_s26 = smov [#allocation7]   ;;  %s565_s8 = scalar_lea.hbm %s747_s3, 2048 }
  0x24   :  { %s46_s28 = sshll.u32 %s619_s26, 4  ;;  %p566_p2 = scmp.ne.s32.totalorder %s747_s3, %s565_s8  ;;  %s47_s28 = int_to_ptr.vmem [resolvable:$true] %s46_s28 }
  0x25   :  { %p569_p3 = scmp.lt.u32.totalorder %s565_s8, %s747_s3 }
  0x27   :  { %p571_p4 = pnand %p569_p3, %p566_p2 }
  0x29   :  { %574 = shalt.err (!%p571_p4)
}
  0x2a   :  { %s575_s15 = scalar_lea.vmem %s47_s28, 2048  ;;  %p580_p6 = scmp.lt.s32.totalorder %s47_s28, %s47_s28 }
  0x2b   :  { %p576_p5 = scmp.ne.s32.totalorder %s47_s28, %s575_s15  ;;  %p581_p7 = scmp.lt.s32.totalorder %s575_s15, %s575_s15 }
  0x2d   :  { %p582_p8 = por %p581_p7, %p580_p6 }
  0x2f   :  { %p583_p9 = pnand %p582_p8, %p576_p5 }
  0x31   :  { %586 = shalt.err (!%p583_p9)
}
  0x32   :  { %52 = dma.hbm_to_vmem [thread:$0]  %s747_s3, 2048, %s47_s28, [#allocation6], %s617_s13, %s617_s13, %s618_s14  }
  0x33   :  { %609 = dma.done.wait [#allocation3], 256  }
  0x34   :  { %610 = vsyncadd [#allocation3], 4294967040 }
  0x35   :  { %611 = dma.done.wait [#allocation6], 4096  }
  0x36   :  { %612 = vsyncadd [#allocation6], 4294963200  ;;  %v70_v0 = vld [vmem:[#allocation5] sm:$0xff]  ;;  %v71_v1 = vld [vmem:[#allocation5 + $0x8] sm:$0xff]  ;;  %s620_s21 = smov [#allocation8]  }
  0x37   :  { %v72_v2 = vld [vmem:[#allocation5 + $0x10] sm:$0xff]  ;;  %v447_v3 = vpack.c.bf16 %v71_v1, %v70_v0  ;;  %v73_v4 = vld [vmem:[#allocation5 + $0x18] sm:$0xff]  ;;  %v74_v6 = vld [vmem:[#allocation5 + $0x20] sm:$0xff]  ;;  %v278_v0 = vlaneseq  ;;  %s324_s22 = sshll.u32 %s620_s21, 4  ;;  %s325_s22 = int_to_ptr.vmem [resolvable:$true] %s324_s22 }
  0x38   :  { %v451_v5 = vpack.c.bf16 %v73_v4, %v72_v2  ;;  %v75_v7 = vld [vmem:[#allocation5 + $0x28] sm:$0xff]  ;;  %v76_v9 = vld [vmem:[#allocation5 + $0x30] sm:$0xff]  ;;  %v77_v11 = vld [vmem:[#allocation5 + $0x38] sm:$0xff]  ;;  %s587_s23 = scalar_lea.vmem %s325_s22, 256  ;;  %p592_p11 = scmp.lt.s32.totalorder %s325_s22, %s325_s22 }
  0x39   :  { %448 = vmatprep.subr.bf16.mxu0 %v447_v3  ;;  %v455_v8 = vpack.c.bf16 %v75_v7, %v74_v6  ;;  %v713_v10 = vld [vmem:[#allocation2] sm:$0xff]  ;;  %v170_v12 = vld [vmem:[#allocation7] sm:$0xff]  ;;  %v171_v13 = vld [vmem:[#allocation7 + $0x8] sm:$0xff]  ;;  %v459_v20 = vpack.c.bf16 %v77_v11, %v76_v9  ;;  %v279_v1 = vand.u32 127, %v278_v0  ;;  %p588_p10 = scmp.ne.s32.totalorder %s325_s22, %s587_s23  ;;  %p593_p12 = scmp.lt.s32.totalorder %s587_s23, %s587_s23 }
  0x3a   :  { %450 = vmatpush3.bf16.msra.mxu0 %v447_v3  ;;  %409 = vmatprep.mubr.f32.mxu0 %v713_v10  ;;  %v479_v14 = vpack.c.bf16 %v171_v13, %v170_v12  ;;  %v172_v15 = vld [vmem:[#allocation7 + $0x10] sm:$0xff]  ;;  %v173_v16 = vld [vmem:[#allocation7 + $0x18] sm:$0xff]  ;;  %v174_v18 = vld [vmem:[#allocation7 + $0x20] sm:$0xff] }
  0x3b   :  { %452 = vmatprep.subr.bf16.mxu0 %v451_v5  ;;  %v483_v17 = vpack.c.bf16 %v173_v16, %v172_v15  ;;  %v175_v19 = vld [vmem:[#allocation7 + $0x28] sm:$0xff]  ;;  %v78_v21 = vld [vmem:[#allocation5 + $0x40] sm:$0xff]  ;;  %v176_v24 = vld [vmem:[#allocation7 + $0x30] sm:$0xff]  ;;  %vm280_vm0 = vcmp.lt.s32.totalorder %v279_v1, 32  ;;  %p594_p13 = por %p593_p12, %p592_p11 }
  0x3c   :  { %480 = vmatprep.subr.bf16.mxu1 %v479_v14  ;;  %v79_v22 = vld [vmem:[#allocation5 + $0x48] sm:$0xff]  ;;  %v487_v23 = vpack.c.bf16 %v175_v19, %v174_v18  ;;  %v177_v25 = vld [vmem:[#allocation7 + $0x38] sm:$0xff]  ;;  %v80_v27 = vld [vmem:[#allocation5 + $0x50] sm:$0xff] }
  0x3d   :  { %482 = vmatpush3.bf16.msra.mxu1 %v479_v14  ;;  %v463_v26 = vpack.c.bf16 %v79_v22, %v78_v21  ;;  %v81_v28 = vld [vmem:[#allocation5 + $0x58] sm:$0xff]  ;;  %v491_v29 = vpack.c.bf16 %v177_v25, %v176_v24  ;;  %v178_v30 = vld [vmem:[#allocation7 + $0x40] sm:$0xff]  ;;  %v179_v31 = vld [vmem:[#allocation7 + $0x48] sm:$0xff]  ;;  %p595_p0 = pnand %p594_p13, %p588_p10 }
  0x3e   :  { %454 = vmatpush3.bf16.msra.mxu0 %v451_v5  ;;  %484 = vmatprep.subr.bf16.mxu1 %v483_v17  ;;  %v467_v32 = vpack.c.bf16 %v81_v28, %v80_v27  ;;  %v82_v33 = vld [vmem:[#allocation5 + $0x60] sm:$0xff]  ;;  %v83_v34 = vld [vmem:[#allocation5 + $0x68] sm:$0xff]  ;;  %v495_v35 = vpack.c.bf16 %v179_v31, %v178_v30  ;;  %v180_v36 = vld [vmem:[#allocation7 + $0x50] sm:$0xff] }
  0x3f   :  { %456 = vmatprep.subr.bf16.mxu0 %v455_v8  ;;  %v181_v37 = vld [vmem:[#allocation7 + $0x58] sm:$0xff]  ;;  %v471_v38 = vpack.c.bf16 %v83_v34, %v82_v33  ;;  %v84_v39 = vld [vmem:[#allocation5 + $0x70] sm:$0xff]  ;;  %v182_v42 = vld [vmem:[#allocation7 + $0x60] sm:$0xff] }
  0x40   :  { %v85_v40 = vld [vmem:[#allocation5 + $0x78] sm:$0xff]  ;;  %v499_v41 = vpack.c.bf16 %v181_v37, %v180_v36  ;;  %v183_v43 = vld [vmem:[#allocation7 + $0x68] sm:$0xff]  ;;  %v184_v47 = vld [vmem:[#allocation7 + $0x70] sm:$0xff] }
  0x41   :  { %486 = vmatpush3.bf16.msra.mxu1 %v483_v17  ;;  %v475_v44 = vpack.c.bf16 %v85_v40, %v84_v39  ;;  %v503_v45 = vpack.c.bf16 %v183_v43, %v182_v42  ;;  %v69_v46 = vld [vmem:[#allocation2 + $0x8] sm:$0xff]  ;;  %v337_v50 = vld [vmem:[%s746_s2] ss:$0 sm:$0xff] }
  0x42   :  { %458 = vmatpush3.bf16.msra.mxu0 %v455_v8  ;;  %488 = vmatprep.subr.bf16.mxu1 %v487_v23  ;;  %v185_v48 = vld [vmem:[#allocation7 + $0x78] sm:$0xff]  ;;  %v338_v57 = vld [vmem:[%s748_s4] ss:$0 sm:$0xff] }
  0x43   :  { %460 = vmatprep.subr.bf16.mxu0 %v459_v20  ;;  %v507_v49 = vpack.c.bf16 %v185_v48, %v184_v47  ;;  %v193_v58 = vadd.f32 %v338_v57, %v713_v10  ;;  %v194_v61 = vadd.f32 %v338_v57, %v69_v46  ;;  %v339_v19 = vld [vmem:[%s749_s5] ss:$0 sm:$0xff] }
  0x44   :  { %v340_v21 = vld [vmem:[%s750_s6] ss:$0 sm:$0xff] }
  0x45   :  { %490 = vmatpush3.bf16.msra.mxu1 %v487_v23 }
  0x46   :  { %462 = vmatpush3.bf16.msra.mxu0 %v459_v20  ;;  %492 = vmatprep.subr.bf16.mxu1 %v491_v29 }
  0x47   :  { %464 = vmatprep.subr.bf16.mxu0 %v463_v26 }
  0x49   :  { %494 = vmatpush3.bf16.msra.mxu1 %v491_v29 }
  0x4a   :  { %466 = vmatpush3.bf16.msra.mxu0 %v463_v26  ;;  %496 = vmatprep.subr.bf16.mxu1 %v495_v35 }
  0x4b   :  { %468 = vmatprep.subr.bf16.mxu0 %v467_v32 }
  0x4d   :  { %498 = vmatpush3.bf16.msra.mxu1 %v495_v35 }
  0x4e   :  { %470 = vmatpush3.bf16.msra.mxu0 %v467_v32  ;;  %500 = vmatprep.subr.bf16.mxu1 %v499_v41 }
  0x4f   :  { %472 = vmatprep.subr.bf16.mxu0 %v471_v38 }
  0x51   :  { %502 = vmatpush3.bf16.msra.mxu1 %v499_v41 }
  0x52   :  { %474 = vmatpush3.bf16.msra.mxu0 %v471_v38  ;;  %504 = vmatprep.subr.bf16.mxu1 %v503_v45 }
  0x53   :  { %476 = vmatprep.subr.bf16.mxu0 %v475_v44 }
  0x55   :  { %506 = vmatpush3.bf16.msra.mxu1 %v503_v45 }
  0x56   :  { %478 = vmatpush3.bf16.msra.mxu0 %v475_v44  ;;  %508 = vmatprep.subr.bf16.mxu1 %v507_v49 }
  0x59   :  { %410 = vmatmul.mubr.f32.vlgmr.msra.gmra.mrb[0].mxu0 %v69_v46  ;;  %510 = vmatpush3.bf16.msra.mxu1 %v507_v49 }
 0x12c   :  { %v411_v51 = vpop.f32.mrb[0].mxu0 }
 0x12d   :  { %v165_v52 = vadd.f32 %v411_v51, %v337_v50  ;;  %v159_v53 = vpop.f32.mrb[1].mxu0 }
 0x12e   :  { %v160_v54 = vadd.f32 %v337_v50, %v159_v53 }
 0x12f   :  { %v169_v56 = vmax.f32 %v165_v52, 0.0 }
 0x130   :  { %v168_v55 = vmax.f32 %v160_v54, 0.0 }
 0x132   :  { %444 = vmatprep.mubr.f32.mxu1 %v168_v55 }
 0x133   :  { %445 = vmatmul.mubr.f32.vlgmr.msra.gmra.mrb[0].mxu1 %v169_v56 }
 0x206   :  { %v446_v59 = vpop.f32.mrb[0].mxu1 }
 0x207   :  { %v261_v60 = vpop.f32.mrb[1].mxu1  ;;  %v267_v63 = vadd.f32 %v446_v59, %v194_v61 }
 0x208   :  { %v262_v62 = vadd.f32 %v261_v60, %v193_v58 }
 0x20a   :  { %270 = vadd.xlane.f32.xlu0 %v262_v62 }
 0x20e   :  { %272 = vadd.xlane.f32.xlu0 %v267_v63 }
 0x297   :  { %v271_v2 = vpop.xlane.xlu0 %270 }
 0x298   :  { %v274_v3 = vmul.f32 0.03125, %v271_v2 }
 0x29a   :  { %v276_v4 = vsub.f32 %v262_v62, %v274_v3 }
 0x29b   :  { %v273_v5 = vpop.xlane.xlu0 %272 }
 0x29c   :  { %v275_v6 = vmul.f32 0.03125, %v273_v5  ;;  %v283_v7 = vsel %vm280_vm0, %v276_v4, 0.0 }
 0x29d   :  { %v285_v8 = vmul.f32 %v283_v7, %v283_v7 }
 0x29e   :  { %v277_v9 = vsub.f32 %v267_v63, %v275_v6 }
 0x29f   :  { %287 = vadd.xlane.f32.xlu1 %v285_v8 }
 0x2a0   :  { %v284_v10 = vsel %vm280_vm0, %v277_v9, 0.0 }
 0x2a1   :  { %v286_v11 = vmul.f32 %v284_v10, %v284_v10 }
 0x2a3   :  { %289 = vadd.xlane.f32.xlu1 %v286_v11 }
 0x32c   :  { %v288_v12 = vpop.xlane.xlu1 %287 }
 0x32d   :  { %v291_v13 = vmul.f32 0.03125, %v288_v12 }
 0x32f   :  { %v293_v14 = vadd.f32 1e-05, %v291_v13 }
 0x330   :  { %v290_v15 = vpop.xlane.xlu1 %289 }
 0x331   :  { %517 = vrsqrt.f32 %v293_v14  ;;  %v292_v16 = vmul.f32 0.03125, %v290_v15 }
 0x333   :  { %v294_v17 = vadd.f32 1e-05, %v292_v16 }
 0x335   :  { %519 = vrsqrt.f32 %v294_v17 }
 0x33b   :  { %v518_v18 = vpop.eup %517 }
 0x33c   :  { %v297_v20 = vmul.f32 %v518_v18, %v283_v7 }
 0x33e   :  { %v306_v22 = vmul.f32 %v339_v19, %v297_v20 }
 0x33f   :  { %v520_v23 = vpop.eup %519 }
 0x340   :  { %v298_v24 = vmul.f32 %v520_v23, %v284_v10  ;;  %v315_v25 = vadd.f32 %v340_v21, %v306_v22 }
 0x342   :  { %v307_v26 = vmul.f32 %v339_v19, %v298_v24  ;;  %317 = vst [vmem:[#allocation8] sm:$0xff] %v315_v25 }
 0x344   :  { %v316_v27 = vadd.f32 %v340_v21, %v307_v26 }
 0x346   :  { %318 = vst [vmem:[#allocation8 + $0x8] sm:$0xff] %v316_v27 }
 0x347   :  { %598 = shalt.err (!%p595_p0)
}
 0x348   :  { %s599_s24 = scalar_lea.hbm %s751_s7, 256 }
 0x349   :  { %p600_p1 = scmp.ne.s32.totalorder %s751_s7, %s599_s24  ;;  %p603_p2 = scmp.lt.u32.totalorder %s599_s24, %s751_s7 }
 0x34b   :  { %p605_p3 = pnand %p603_p2, %p600_p1 }
 0x34d   :  { %608 = shalt.err (!%p605_p3)
}
 0x34e   :  { %330 = dma.vmem_to_hbm [thread:$0]  %s325_s22, 256, %s751_s7, [#allocation4], %s617_s13, %s617_s13, %s618_s14  }
 0x34f   :  { %613 = dma.done.wait [#allocation4], 256  }
 0x350   :  { %614 = vsyncadd [#allocation4], 4294967040 }
 0x351   :  { %334 = vsyncpa [#allocation3], 1 }
 0x352   :  { %335 = vsyncpa [#allocation6], 1 }
 0x353   :  { %336 = vsyncpa [#allocation4], 1 }

// kernel: tpu_custom_call.1
= control target key start
LH: loop header
LB: loop body
LE: loop exit
PB: predicated region body
PF: predicated region fallthrough
CT: control target
= control target key end

     0   :  { %12 = vsyncpa [#allocation3], 0  ;;  %s744_s0 = inlined_call_operand.hbm [shape: f32[16,128], index: 0, kind: input, shape index: {}]   ;;  %s745_s1 = inlined_call_operand.hbm [shape: f32[128,128], index: 1, kind: input, shape index: {}]   ;;  %s746_s2 = inlined_call_operand.vmem [shape: f32[1,128], index: 2, kind: input, shape index: {}]   ;;  %s747_s3 = inlined_call_operand.hbm [shape: f32[128,128], index: 3, kind: input, shape index: {}]   ;;  %s748_s4 = inlined_call_operand.vmem [shape: f32[1,128], index: 4, kind: input, shape index: {}]   ;;  %s749_s5 = inlined_call_operand.vmem [shape: f32[1,128], index: 5, kind: input, shape index: {}]   ;;  %s750_s6 = inlined_call_operand.vmem [shape: f32[1,128], index: 6, kind: input, shape index: {}]   ;;  %s751_s7 = inlined_call_operand.hbm [shape: f32[16,128], index: 7, kind: output, shape index: {}]  }
   0x1   :  { %13 = vsyncpa [#allocation6], 0 }
   0x2   :  { %14 = vsyncpa [#allocation4], 0  ;;  %s615_s24 = smov [#allocation5]   ;;  %s616_s26 = smov [#allocation2]  }
   0x3   :  { %s32_s25 = sshll.u32 %s615_s24, 4  ;;  %s20_s27 = sshll.u32 %s616_s26, 4  ;;  %s33_s25 = int_to_ptr.vmem [resolvable:$true] %s32_s25  ;;  %s661_s27 = int_to_ptr.vmem [resolvable:$true] %s20_s27 }
   0x4   :  { %s521_s30 = scalar_lea.hbm %s745_s1, 2048 }
   0x5   :  { %p522_p0 = scmp.ne.s32.totalorder %s745_s1, %s521_s30  ;;  %p525_p1 = scmp.lt.u32.totalorder %s521_s30, %s745_s1 }
   0x7   :  { %p527_p2 = pnand %p525_p1, %p522_p0 }
   0x9   :  { %530 = shalt.err (!%p527_p2)
}
   0xa   :  { %s531_s12 = scalar_lea.vmem %s33_s25, 2048  ;;  %p536_p4 = scmp.lt.s32.totalorder %s33_s25, %s33_s25 }
   0xb   :  { %p532_p3 = scmp.ne.s32.totalorder %s33_s25, %s531_s12  ;;  %p537_p5 = scmp.lt.s32.totalorder %s531_s12, %s531_s12 }
   0xd   :  { %p538_p6 = por %p537_p5, %p536_p4 }
   0xf   :  { %p539_p7 = pnand %p538_p6, %p532_p3 }
  0x11   :  { %542 = shalt.err (!%p539_p7)
}
  0x12   :  { %s617_s13 = smov 128   ;;  %s618_s14 = smov 8  }
  0x13   :  { %38 = dma.hbm_to_vmem [thread:$0]  %s745_s1, 2048, %s33_s25, [#allocation6], %s617_s13, %s617_s13, %s618_s14  }
  0x14   :  { %s543_s19 = scalar_lea.hbm %s744_s0, 256 }
  0x15   :  { %p544_p8 = scmp.ne.s32.totalorder %s744_s0, %s543_s19  ;;  %p547_p9 = scmp.lt.u32.totalorder %s543_s19, %s744_s0 }
  0x17   :  { %p549_p10 = pnand %p547_p9, %p544_p8 }
  0x19   :  { %552 = shalt.err (!%p549_p10)
}
  0x1a   :  { %s553_s24 = scalar_lea.vmem %s661_s27, 256  ;;  %p558_p12 = scmp.lt.s32.totalorder %s661_s27, %s661_s27 }
  0x1b   :  { %p554_p11 = scmp.ne.s32.totalorder %s661_s27, %s553_s24  ;;  %p559_p13 = scmp.lt.s32.totalorder %s553_s24, %s553_s24 }
  0x1d   :  { %p560_p0 = por %p559_p13, %p558_p12 }
  0x1f   :  { %p561_p1 = pnand %p560_p0, %p554_p11 }
  0x21   :  { %564 = shalt.err (!%p561_p1)
}
  0x22   :  { %26 = dma.hbm_to_vmem [thread:$0]  %s744_s0, 256, %s661_s27, [#allocation3], %s617_s13, %s617_s13, %s618_s14  }
  0x23   :  { %s619_s26 = smov [#allocation7]   ;;  %s565_s8 = scalar_lea.hbm %s747_s3, 2048 }
  0x24   :  { %s46_s28 = sshll.u32 %s619_s26, 4  ;;  %p566_p2 = scmp.ne.s32.totalorder %s747_s3, %s565_s8  ;;  %s47_s28 = int_to_ptr.vmem [resolvable:$true] %s46_s28 }
  0x25   :  { %p569_p3 = scmp.lt.u32.totalorder %s565_s8, %s747_s3 }
  0x27   :  { %p571_p4 = pnand %p569_p3, %p566_p2 }
  0x29   :  { %574 = shalt.err (!%p571_p4)
}
  0x2a   :  { %s575_s15 = scalar_lea.vmem %s47_s28, 2048  ;;  %p580_p6 = scmp.lt.s32.totalorder %s47_s28, %s47_s28 }
  0x2b   :  { %p576_p5 = scmp.ne.s32.totalorder %s47_s28, %s575_s15  ;;  %p581_p7 = scmp.lt.s32.totalorder %s575_s15, %s575_s15 }
  0x2d   :  { %p582_p8 = por %p581_p7, %p580_p6 }
  0x2f   :  { %p583_p9 = pnand %p582_p8, %p576_p5 }
  0x31   :  { %586 = shalt.err (!%p583_p9)
}
  0x32   :  { %52 = dma.hbm_to_vmem [thread:$0]  %s747_s3, 2048, %s47_s28, [#allocation6], %s617_s13, %s617_s13, %s618_s14  }
  0x33   :  { %609 = dma.done.wait [#allocation3], 256  }
  0x34   :  { %610 = vsyncadd [#allocation3], 4294967040 }
  0x35   :  { %611 = dma.done.wait [#allocation6], 4096  }
  0x36   :  { %612 = vsyncadd [#allocation6], 4294963200  ;;  %v70_v0 = vld [vmem:[#allocation5] sm:$0xff]  ;;  %v71_v1 = vld [vmem:[#allocation5 + $0x8] sm:$0xff]  ;;  %s620_s21 = smov [#allocation8]  }
  0x37   :  { %v72_v2 = vld [vmem:[#allocation5 + $0x10] sm:$0xff]  ;;  %v447_v3 = vpack.c.bf16 %v71_v1, %v70_v0  ;;  %v73_v4 = vld [vmem:[#allocation5 + $0x18] sm:$0xff]  ;;  %v74_v6 = vld [vmem:[#allocation5 + $0x20] sm:$0xff]  ;;  %v278_v0 = vlaneseq  ;;  %s324_s22 = sshll.u32 %s620_s21, 4  ;;  %s325_s22 = int_to_ptr.vmem [resolvable:$true] %s324_s22 }
  0x38   :  { %v451_v5 = vpack.c.bf16 %v73_v4, %v72_v2  ;;  %v75_v7 = vld [vmem:[#allocation5 + $0x28] sm:$0xff]  ;;  %v76_v9 = vld [vmem:[#allocation5 + $0x30] sm:$0xff]  ;;  %v77_v11 = vld [vmem:[#allocation5 + $0x38] sm:$0xff]  ;;  %s587_s23 = scalar_lea.vmem %s325_s22, 256  ;;  %p592_p11 = scmp.lt.s32.totalorder %s325_s22, %s325_s22 }
  0x39   :  { %448 = vmatprep.subr.bf16.mxu0 %v447_v3  ;;  %v455_v8 = vpack.c.bf16 %v75_v7, %v74_v6  ;;  %v713_v10 = vld [vmem:[#allocation2] sm:$0xff]  ;;  %v170_v12 = vld [vmem:[#allocation7] sm:$0xff]  ;;  %v171_v13 = vld [vmem:[#allocation7 + $0x8] sm:$0xff]  ;;  %v459_v20 = vpack.c.bf16 %v77_v11, %v76_v9  ;;  %v279_v1 = vand.u32 127, %v278_v0  ;;  %p588_p10 = scmp.ne.s32.totalorder %s325_s22, %s587_s23  ;;  %p593_p12 = scmp.lt.s32.totalorder %s587_s23, %s587_s23 }
  0x3a   :  { %450 = vmatpush3.bf16.msra.mxu0 %v447_v3  ;;  %409 = vmatprep.mubr.f32.mxu0 %v713_v10  ;;  %v479_v14 = vpack.c.bf16 %v171_v13, %v170_v12  ;;  %v172_v15 = vld [vmem:[#allocation7 + $0x10] sm:$0xff]  ;;  %v173_v16 = vld [vmem:[#allocation7 + $0x18] sm:$0xff]  ;;  %v174_v18 = vld [vmem:[#allocation7 + $0x20] sm:$0xff] }
  0x3b   :  { %452 = vmatprep.subr.bf16.mxu0 %v451_v5  ;;  %v483_v17 = vpack.c.bf16 %v173_v16, %v172_v15  ;;  %v175_v19 = vld [vmem:[#allocation7 + $0x28] sm:$0xff]  ;;  %v78_v21 = vld [vmem:[#allocation5 + $0x40] sm:$0xff]  ;;  %v176_v24 = vld [vmem:[#allocation7 + $0x30] sm:$0xff]  ;;  %vm280_vm0 = vcmp.lt.s32.totalorder %v279_v1, 32  ;;  %p594_p13 = por %p593_p12, %p592_p11 }
  0x3c   :  { %480 = vmatprep.subr.bf16.mxu1 %v479_v14  ;;  %v79_v22 = vld [vmem:[#allocation5 + $0x48] sm:$0xff]  ;;  %v487_v23 = vpack.c.bf16 %v175_v19, %v174_v18  ;;  %v177_v25 = vld [vmem:[#allocation7 + $0x38] sm:$0xff]  ;;  %v80_v27 = vld [vmem:[#allocation5 + $0x50] sm:$0xff] }
  0x3d   :  { %482 = vmatpush3.bf16.msra.mxu1 %v479_v14  ;;  %v463_v26 = vpack.c.bf16 %v79_v22, %v78_v21  ;;  %v81_v28 = vld [vmem:[#allocation5 + $0x58] sm:$0xff]  ;;  %v491_v29 = vpack.c.bf16 %v177_v25, %v176_v24  ;;  %v178_v30 = vld [vmem:[#allocation7 + $0x40] sm:$0xff]  ;;  %v179_v31 = vld [vmem:[#allocation7 + $0x48] sm:$0xff]  ;;  %p595_p0 = pnand %p594_p13, %p588_p10 }
  0x3e   :  { %454 = vmatpush3.bf16.msra.mxu0 %v451_v5  ;;  %484 = vmatprep.subr.bf16.mxu1 %v483_v17  ;;  %v467_v32 = vpack.c.bf16 %v81_v28, %v80_v27  ;;  %v82_v33 = vld [vmem:[#allocation5 + $0x60] sm:$0xff]  ;;  %v83_v34 = vld [vmem:[#allocation5 + $0x68] sm:$0xff]  ;;  %v495_v35 = vpack.c.bf16 %v179_v31, %v178_v30  ;;  %v180_v36 = vld [vmem:[#allocation7 + $0x50] sm:$0xff] }
  0x3f   :  { %456 = vmatprep.subr.bf16.mxu0 %v455_v8  ;;  %v181_v37 = vld [vmem:[#allocation7 + $0x58] sm:$0xff]  ;;  %v471_v38 = vpack.c.bf16 %v83_v34, %v82_v33  ;;  %v84_v39 = vld [vmem:[#allocation5 + $0x70] sm:$0xff]  ;;  %v182_v42 = vld [vmem:[#allocation7 + $0x60] sm:$0xff] }
  0x40   :  { %v85_v40 = vld [vmem:[#allocation5 + $0x78] sm:$0xff]  ;;  %v499_v41 = vpack.c.bf16 %v181_v37, %v180_v36  ;;  %v183_v43 = vld [vmem:[#allocation7 + $0x68] sm:$0xff]  ;;  %v184_v47 = vld [vmem:[#allocation7 + $0x70] sm:$0xff] }
  0x41   :  { %486 = vmatpush3.bf16.msra.mxu1 %v483_v17  ;;  %v475_v44 = vpack.c.bf16 %v85_v40, %v84_v39  ;;  %v503_v45 = vpack.c.bf16 %v183_v43, %v182_v42  ;;  %v69_v46 = vld [vmem:[#allocation2 + $0x8] sm:$0xff]  ;;  %v337_v50 = vld [vmem:[%s746_s2] ss:$0 sm:$0xff] }
  0x42   :  { %458 = vmatpush3.bf16.msra.mxu0 %v455_v8  ;;  %488 = vmatprep.subr.bf16.mxu1 %v487_v23  ;;  %v185_v48 = vld [vmem:[#allocation7 + $0x78] sm:$0xff]  ;;  %v338_v57 = vld [vmem:[%s748_s4] ss:$0 sm:$0xff] }
  0x43   :  { %460 = vmatprep.subr.bf16.mxu0 %v459_v20  ;;  %v507_v49 = vpack.c.bf16 %v185_v48, %v184_v47  ;;  %v193_v58 = vadd.f32 %v338_v57, %v713_v10  ;;  %v194_v61 = vadd.f32 %v338_v57, %v69_v46  ;;  %v339_v19 = vld [vmem:[%s749_s5] ss:$0 sm:$0xff] }
  0x44   :  { %v340_v21 = vld [vmem:[%s750_s6] ss:$0 sm:$0xff] }
  0x45   :  { %490 = vmatpush3.bf16.msra.mxu1 %v487_v23 }
  0x46   :  { %462 = vmatpush3.bf16.msra.mxu0 %v459_v20  ;;  %492 = vmatprep.subr.bf16.mxu1 %v491_v29 }
  0x47   :  { %464 = vmatprep.subr.bf16.mxu0 %v463_v26 }
  0x49   :  { %494 = vmatpush3.bf16.msra.mxu1 %v491_v29 }
  0x4a   :  { %466 = vmatpush3.bf16.msra.mxu0 %v463_v26  ;;  %496 = vmatprep.subr.bf16.mxu1 %v495_v35 }
  0x4b   :  { %468 = vmatprep.subr.bf16.mxu0 %v467_v32 }
  0x4d   :  { %498 = vmatpush3.bf16.msra.mxu1 %v495_v35 }
  0x4e   :  { %470 = vmatpush3.bf16.msra.mxu0 %v467_v32  ;;  %500 = vmatprep.subr.bf16.mxu1 %v499_v41 }
  0x4f   :  { %472 = vmatprep.subr.bf16.mxu0 %v471_v38 }
  0x51   :  { %502 = vmatpush3.bf16.msra.mxu1 %v499_v41 }
  0x52   :  { %474 = vmatpush3.bf16.msra.mxu0 %v471_v38  ;;  %504 = vmatprep.subr.bf16.mxu1 %v503_v45 }
  0x53   :  { %476 = vmatprep.subr.bf16.mxu0 %v475_v44 }
  0x55   :  { %506 = vmatpush3.bf16.msra.mxu1 %v503_v45 }
  0x56   :  { %478 = vmatpush3.bf16.msra.mxu0 %v475_v44  ;;  %508 = vmatprep.subr.bf16.mxu1 %v507_v49 }
  0x59   :  { %410 = vmatmul.mubr.f32.vlgmr.msra.gmra.mrb[0].mxu0 %v69_v46  ;;  %510 = vmatpush3.bf16.msra.mxu1 %v507_v49 }
 0x12c   :  { %v411_v51 = vpop.f32.mrb[0].mxu0 }
 0x12d   :  { %v165_v52 = vadd.f32 %v411_v51, %v337_v50  ;;  %v159_v53 = vpop.f32.mrb[1].mxu0 }
 0x12e   :  { %v160_v54 = vadd.f32 %v337_v50, %v159_v53 }
 0x12f   :  { %v169_v56 = vmax.f32 %v165_v52, 0.0 }
 0x130   :  { %v168_v55 = vmax.f32 %v160_v54, 0.0 }
 0x132   :  { %444 = vmatprep.mubr.f32.mxu1 %v168_v55 }
 0x133   :  { %445 = vmatmul.mubr.f32.vlgmr.msra.gmra.mrb[0].mxu1 %v169_v56 }
 0x206   :  { %v446_v59 = vpop.f32.mrb[0].mxu1 }
 0x207   :  { %v261_v60 = vpop.f32.mrb[1].mxu1  ;;  %v267_v63 = vadd.f32 %v446_v59, %v194_v61 }
 0x208   :  { %v262_v62 = vadd.f32 %v261_v60, %v193_v58 }
 0x20a   :  { %270 = vadd.xlane.f32.xlu0 %v262_v62 }
 0x20e   :  { %272 = vadd.xlane.f32.xlu0 %v267_v63 }
 0x297   :  { %v271_v2 = vpop.xlane.xlu0 %270 }
 0x298   :  { %v274_v3 = vmul.f32 0.03125, %v271_v2 }
 0x29a   :  { %v276_v4 = vsub.f32 %v262_v62, %v274_v3 }
 0x29b   :  { %v273_v5 = vpop.xlane.xlu0 %272 }
 0x29c   :  { %v275_v6 = vmul.f32 0.03125, %v273_v5  ;;  %v283_v7 = vsel %vm280_vm0, %v276_v4, 0.0 }
 0x29d   :  { %v285_v8 = vmul.f32 %v283_v7, %v283_v7 }
 0x29e   :  { %v277_v9 = vsub.f32 %v267_v63, %v275_v6 }
 0x29f   :  { %287 = vadd.xlane.f32.xlu1 %v285_v8 }
 0x2a0   :  { %v284_v10 = vsel %vm280_vm0, %v277_v9, 0.0 }
 0x2a1   :  { %v286_v11 = vmul.f32 %v284_v10, %v284_v10 }
 0x2a3   :  { %289 = vadd.xlane.f32.xlu1 %v286_v11 }
 0x32c   :  { %v288_v12 = vpop.xlane.xlu1 %287 }
 0x32d   :  { %v291_v13 = vmul.f32 0.03125, %v288_v12 }
 0x32f   :  { %v293_v14 = vadd.f32 1e-05, %v291_v13 }
 0x330   :  { %v290_v15 = vpop.xlane.xlu1 %289 }
 0x331   :  { %517 = vrsqrt.f32 %v293_v14  ;;  %v292_v16 = vmul.f32 0.03125, %v290_v15 }
 0x333   :  { %v294_v17 = vadd.f32 1e-05, %v292_v16 }
 0x335   :  { %519 = vrsqrt.f32 %v294_v17 }
 0x33b   :  { %v518_v18 = vpop.eup %517 }
 0x33c   :  { %v297_v20 = vmul.f32 %v518_v18, %v283_v7 }
 0x33e   :  { %v306_v22 = vmul.f32 %v339_v19, %v297_v20 }
 0x33f   :  { %v520_v23 = vpop.eup %519 }
 0x340   :  { %v298_v24 = vmul.f32 %v520_v23, %v284_v10  ;;  %v315_v25 = vadd.f32 %v340_v21, %v306_v22 }
 0x342   :  { %v307_v26 = vmul.f32 %v339_v19, %v298_v24  ;;  %317 = vst [vmem:[#allocation8] sm:$0xff] %v315_v25 }
 0x344   :  { %v316_v27 = vadd.f32 %v340_v21, %v307_v26 }
 0x346   :  { %318 = vst [vmem:[#allocation8 + $0x8] sm:$0xff] %v316_v27 }
 0x347   :  { %598 = shalt.err (!%p595_p0)
}
 0x348   :  { %s599_s24 = scalar_lea.hbm %s751_s7, 256 }
 0x349   :  { %p600_p1 = scmp.ne.s32.totalorder %s751_s7, %s599_s24  ;;  %p603_p2 = scmp.lt.u32.totalorder %s599_s24, %s751_s7 }
 0x34b   :  { %p605_p3 = pnand %p603_p2, %p600_p1 }
 0x34d   :  { %608 = shalt.err (!%p605_p3)
}
 0x34e   :  { %330 = dma.vmem_to_hbm [thread:$0]  %s325_s22, 256, %s751_s7, [#allocation4], %s617_s13, %s617_s13, %s618_s14  }
 0x34f   :  { %613 = dma.done.wait [#allocation4], 256  }
 0x350   :  { %614 = vsyncadd [#allocation4], 4294967040 }
 0x351   :  { %334 = vsyncpa [#allocation3], 1 }
 0x352   :  { %335 = vsyncpa [#allocation6], 1 }
 0x353   :  { %336 = vsyncpa [#allocation4], 1 }

</bundles_post_ra>
